<compile_context>
chip_gen: v7x
topology: tpu7x:2x2x1
jax: 0.10.0
libtpu: 0.0.40
codegen_flags: <defaults>
</compile_context>

<pallas_src>
import functools

import jax
import jax.numpy as jnp
from jax.experimental import pallas as pl
from jax.experimental.pallas import tpu as pltpu


_LAYER_ORDER = ("conv1", "conv2", "conv3", "conv5", "conv4")  # == PyTorch forward order


def _round_up(x, m):
    return ((x + m - 1) // m) * m


def _fused_graphsage_kernel(adj_hbm_ref, x_ref, ws_ref, wn_ref, b_ref, invdeg_ref,
                            o_ref, a_vmem, a_sem, *, num_layers):
    """Entire 5-layer GraphSAGE forward; single block, everything VMEM-resident.

    adj_hbm_ref : [Np, Np]      bf16  0/1 adjacency, left in HBM (pl.ANY)
    x_ref       : [Np, Fp]      bf16  input node features (padded)
    ws_ref      : [L, Fp, Fp]   bf16  per-layer W_self  (padded)
    wn_ref      : [L, Fp, Fp]   bf16  per-layer W_neigh (padded)
    b_ref       : [L, 1, Fp]    f32   per-layer bias    (padded)
    invdeg_ref  : [Np, 1]       f32   reciprocal in-degree
    o_ref       : [Np, Fp]      f32   output node features (padded)
    a_vmem      : [Np, Np]      bf16  VMEM scratch for the adjacency
    a_sem       : DMA semaphore
    """
    # Kick off the O(N^2) adjacency stream immediately so it overlaps with the
    # layer-1 self projection below (which does not need the adjacency).
    a_copy = pltpu.make_async_copy(adj_hbm_ref, a_vmem, a_sem)
    a_copy.start()

    h = x_ref[...]                      # bf16 [Np, Fp]
    inv_deg = invdeg_ref[...]           # f32  [Np, 1]

    # Layer-1 self term (MXU, f32 accumulate) runs while the adjacency DMA flies.
    acc = jnp.dot(h, ws_ref[0], preferred_element_type=jnp.float32)

    a_copy.wait()
    adj = a_vmem[...]                   # bf16 0/1 adjacency (exactly representable)

    out = None
    for l in range(num_layers):         # static unroll over the 5 layers
        if l > 0:
            acc = jnp.dot(h, ws_ref[l], preferred_element_type=jnp.float32)
        # Exact in-neighbor mean: 0/1 adjacency matmul on the MXU (f32 acc),
        # then the f32 1/deg row scale on the VPU.
        h_neigh = jnp.dot(adj, h, preferred_element_type=jnp.float32) * inv_deg
        acc = acc + jnp.dot(h_neigh.astype(jnp.bfloat16), wn_ref[l],
                            preferred_element_type=jnp.float32)
        out = acc + b_ref[l]
        if l < num_layers - 1:
            # ReLU (f32 epilogue); Dropout(0.5) is identity in eval mode.
            h = jnp.maximum(out, 0.0).astype(jnp.bfloat16)
    o_ref[...] = out.astype(o_ref.dtype)


def stack_params(params):
    """Zero-pad + stack the 5 layers into separate W_self/W_neigh/bias stacks.

    Returns (w_self [L,Fp,Fp] bf16, w_neigh [L,Fp,Fp] bf16, bias [L,1,Fp] f32, f_pad).
    Padded feature rows/cols are zero, so padded activation columns stay zero
    through every layer (including ReLU) -> slicing at the end is exact.
    """
    f_max = 0
    for name in _LAYER_ORDER:
        fin, fout = params[name][0].shape
        f_max = max(f_max, fin, fout)
    f_pad = _round_up(f_max, 128)       # feature dims are lane-facing -> 128

    ws, wn, bs = [], [], []
    for name in _LAYER_ORDER:
        w_self, w_neigh, bias = params[name]
        fin, fout = w_self.shape
        ws.append(jnp.zeros((f_pad, f_pad), jnp.float32).at[:fin, :fout].set(w_self))
        wn.append(jnp.zeros((f_pad, f_pad), jnp.float32).at[:fin, :fout].set(w_neigh))
        bs.append(jnp.zeros((1, f_pad), jnp.float32).at[:, :fout].set(bias))
    return (jnp.stack(ws).astype(jnp.bfloat16),
            jnp.stack(wn).astype(jnp.bfloat16),
            jnp.stack(bs),
            f_pad)


def prepare_graph(adj):
    """One-time graph preprocessing (cache per graph to hoist the O(N^2) pad+cast
    off the per-forward HBM path): 0/1 dense adjacency [N,N] (adj[i,j]==1 iff
    edge j->i) -> (padded bf16 adjacency [Np,Np], f32 reciprocal in-degree [Np,1])."""
    n = adj.shape[0]
    n_pad = _round_up(n, 16)            # node dim is sublane-facing -> bf16 granule 16
    adj_p = jnp.zeros((n_pad, n_pad), jnp.float32).at[:n, :n].set(adj)
    deg = jnp.sum(adj_p, axis=1, keepdims=True)
    inv_deg = jnp.where(deg > 0, 1.0 / jnp.maximum(deg, 1.0), 0.0)
    return adj_p.astype(jnp.bfloat16), inv_deg


def _vmem_limit_bytes(n_pad, f_pad, num_layers):
    """Scoped-VMEM budget sized from the actual kernel footprint (+ headroom)."""
    adj_scratch = 2 * n_pad * n_pad                     # bf16 adjacency in VMEM
    activations = 2 * n_pad * f_pad                     # bf16 input / h
    weights = 2 * 2 * num_layers * f_pad * f_pad        # bf16 W_self + W_neigh stacks
    bias = 4 * num_layers * f_pad                       # f32 bias stack
    invdeg = 4 * n_pad                                  # f32 1/deg
    out = 4 * n_pad * f_pad                             # f32 output
    transients = 8 * 4 * n_pad * f_pad                  # live f32 temporaries (generous)
    return int(adj_scratch + activations + weights + bias + invdeg + out
               + transients + (8 << 20))


@functools.partial(jax.jit, static_argnames=("out_feats",))
def graphsage_forward(adj_p, inv_deg, x, w_self, w_neigh, bias, *, out_feats):
    """Forward pass of the 5-layer GraphSAGE module (eval mode).

    adj_p / inv_deg come from prepare_graph (cacheable per graph);
    w_self / w_neigh / bias come from stack_params (cacheable per model).
    """
    n, in_feats = x.shape
    n_pad = adj_p.shape[0]
    f_pad = w_self.shape[-1]
    num_layers = w_self.shape[0]

    # Per-call feature padding (O(N*F), cheap) + bf16 cast of the MXU operand.
    x_p = jnp.zeros((n_pad, f_pad), jnp.float32).at[:n, :in_feats].set(x)
    x_p = x_p.astype(jnp.bfloat16)

    vmem_limit = _vmem_limit_bytes(n_pad, f_pad, num_layers)
    # TODO(synk): fall back to a row/col-tiled multi-call path for graphs that
    # exceed the v7x 64 MiB VMEM ceiling instead of asserting.
    assert vmem_limit <= (64 << 20), (
        f"fused-resident GraphSAGE needs {vmem_limit} B VMEM > 64 MiB (v7x ceiling); "
        "use a tiled per-layer path for this graph size")

    kernel = functools.partial(_fused_graphsage_kernel, num_layers=num_layers)
    out_p = pl.pallas_call(
        kernel,
        out_shape=jax.ShapeDtypeStruct((n_pad, f_pad), jnp.float32),
        in_specs=[
            pl.BlockSpec(memory_space=pl.ANY),                  # adjacency stays in HBM
            pl.BlockSpec(memory_space=pltpu.MemorySpace.VMEM),  # x
            pl.BlockSpec(memory_space=pltpu.MemorySpace.VMEM),  # W_self stack
            pl.BlockSpec(memory_space=pltpu.MemorySpace.VMEM),  # W_neigh stack
            pl.BlockSpec(memory_space=pltpu.MemorySpace.VMEM),  # bias stack
            pl.BlockSpec(memory_space=pltpu.MemorySpace.VMEM),  # 1/deg
        ],
        out_specs=pl.BlockSpec(memory_space=pltpu.MemorySpace.VMEM),
        scratch_shapes=[
            pltpu.VMEM((n_pad, n_pad), jnp.bfloat16),           # adjacency landing buffer
            pltpu.SemaphoreType.DMA,                            # its DMA semaphore
        ],
        compiler_params=pltpu.CompilerParams(vmem_limit_bytes=vmem_limit),
    )(adj_p, x_p, w_self, w_neigh, bias, inv_deg)
    return out_p[:n, :out_feats]


def graphsage_reference(adj, x, params):
    """Pure-JAX f32 reference of the same forward (for a sanity check)."""
    deg = jnp.sum(adj, axis=1, keepdims=True)
    a_norm = adj / jnp.maximum(deg, 1.0)
    h = x
    for i, name in enumerate(_LAYER_ORDER):
        w_self, w_neigh, b = params[name]
        h_out = h @ w_self + (a_norm @ h) @ w_neigh + b
        if i < len(_LAYER_ORDER) - 1:
            h_out = jnp.maximum(h_out, 0.0)     # dropout = identity in eval mode
        h = h_out
    return h


def init_params(key, in_feats, h_feats):
    """Deterministic synthetic parameters for the 5 SAGEConv layers.

    Weights are stored as [F_in, F_out] (already transposed vs torch nn.Linear).
    """
    params = {}
    dims = {
        "conv1": (in_feats, h_feats),
        "conv2": (h_feats, h_feats),
        "conv3": (h_feats, h_feats),
        "conv4": (h_feats, h_feats),
        "conv5": (h_feats, h_feats),
    }
    for name, (fin, fout) in dims.items():
        key, k1, k2 = jax.random.split(key, 3)
        scale = 1.0 / jnp.sqrt(jnp.float32(fin))
        w_self = jax.random.uniform(k1, (fin, fout), jnp.float32, -scale, scale)
        w_neigh = jax.random.uniform(k2, (fin, fout), jnp.float32, -scale, scale)
        bias = jnp.zeros((1, fout), jnp.float32)
        params[name] = (w_self, w_neigh, bias)
    return params


def make_graph(key, n_nodes):
    """Random directed 0/1 adjacency [N, N] with self-loops; adj[i,j]==1 means edge j->i."""
    adj = jax.random.bernoulli(key, p=0.15, shape=(n_nodes, n_nodes)).astype(jnp.float32)
    return jnp.maximum(adj, jnp.eye(n_nodes, dtype=jnp.float32))


if __name__ == "__main__":
    N_NODES = 64
    IN_FEATS = 32
    H_FEATS = 32

    root = jax.random.PRNGKey(0)
    k_graph, k_feat, k_param = jax.random.split(root, 3)

    adj = make_graph(k_graph, N_NODES)                               # [N, N] 0/1
    x = jax.random.normal(k_feat, (N_NODES, IN_FEATS), jnp.float32)  # [N, Fin]
    params = init_params(k_param, IN_FEATS, H_FEATS)

    # One-time (cacheable) preprocessing of the graph and the model parameters.
    adj_p, inv_deg = prepare_graph(adj)
    w_self, w_neigh, bias, _ = stack_params(params)

    out = graphsage_forward(adj_p, inv_deg, x, w_self, w_neigh, bias,
                            out_feats=H_FEATS)
    out = jax.block_until_ready(out)

    assert out.shape == (N_NODES, H_FEATS)
    assert bool(jnp.all(jnp.isfinite(out)))

    ref = graphsage_reference(adj, x, params)
    rel_err = float(jnp.max(jnp.abs(out - ref)) / (jnp.max(jnp.abs(ref)) + 1e-6))
    assert rel_err < 0.08, f"kernel vs f32 reference relative error too large: {rel_err}"

    print("KERNEL_OK")
</pallas_src>

<mosaic_0001>
module attributes {stable_mosaic.version = 11 : i64} {
  func.func @_fused_graphsage_kernel(%arg0: memref<64x64xbf16, #tpu.memory_space<any>>, %arg1: memref<64x128xbf16, #tpu.memory_space<vmem>>, %arg2: memref<5x128x128xbf16, #tpu.memory_space<vmem>>, %arg3: memref<5x128x128xbf16, #tpu.memory_space<vmem>>, %arg4: memref<5x1x128xf32, #tpu.memory_space<vmem>>, %arg5: memref<64x1xf32, #tpu.memory_space<vmem>>, %arg6: memref<64x128xf32, #tpu.memory_space<vmem>>, %arg7: memref<64x64xbf16, #tpu.memory_space<vmem>>, %arg8: memref<!tpu.dma_semaphore, #tpu.memory_space<semaphore_mem>>) attributes {dimension_semantics = [], scalar_prefetch = 0 : i64, scratch_operands = 2 : i64, tpu.core_type = #tpu.core_type<tc>} {
    tpu.enqueue_dma source(%arg0 : memref<64x64xbf16, #tpu.memory_space<any>>) target(%arg7 : memref<64x64xbf16, #tpu.memory_space<vmem>>) target_semaphore(%arg8 : memref<!tpu.dma_semaphore, #tpu.memory_space<semaphore_mem>>)
    %c0 = arith.constant 0 : index
    %c0_0 = arith.constant 0 : index
    %0 = vector.load %arg1[%c0, %c0_0] : memref<64x128xbf16, #tpu.memory_space<vmem>>, vector<64x128xbf16>
    %c0_1 = arith.constant 0 : index
    %c0_2 = arith.constant 0 : index
    %1 = vector.load %arg5[%c0_1, %c0_2] : memref<64x1xf32, #tpu.memory_space<vmem>>, vector<64x1xf32>
    %c0_3 = arith.constant 0 : index
    %c0_4 = arith.constant 0 : index
    %c0_5 = arith.constant 0 : index
    %2 = vector.load %arg2[%c0_3, %c0_4, %c0_5] : memref<5x128x128xbf16, #tpu.memory_space<vmem>>, vector<1x128x128xbf16>
    %3 = vector.shape_cast %2 : vector<1x128x128xbf16> to vector<128x128xbf16>
    %cst = arith.constant dense<0.000000e+00> : vector<64x128xf32>
    %4 = tpu.matmul %0, %3, %cst {dimension_numbers = #tpu.dot_dimension_numbers<[1], [0], [0], [1], [0, 0, 1, 1], [], []>} : vector<64x128xbf16>, vector<128x128xbf16>, vector<64x128xf32> -> vector<64x128xf32>
    tpu.wait_dma2 semaphore(%arg8 : memref<!tpu.dma_semaphore, #tpu.memory_space<semaphore_mem>>) src(%arg0 : memref<64x64xbf16, #tpu.memory_space<any>>) dst(%arg7 : memref<64x64xbf16, #tpu.memory_space<vmem>>)
    %c0_6 = arith.constant 0 : index
    %c0_7 = arith.constant 0 : index
    %5 = vector.load %arg7[%c0_6, %c0_7] : memref<64x64xbf16, #tpu.memory_space<vmem>>, vector<64x64xbf16>
    %cst_8 = arith.constant dense<0.000000e+00> : vector<64x128xf32>
    %6 = tpu.matmul %5, %0, %cst_8 {dimension_numbers = #tpu.dot_dimension_numbers<[1], [0], [0], [1], [0, 0, 1, 1], [], []>} : vector<64x64xbf16>, vector<64x128xbf16>, vector<64x128xf32> -> vector<64x128xf32>
    %7 = vector.broadcast %1 : vector<64x1xf32> to vector<64x128xf32>
    %8 = arith.mulf %6, %7 : vector<64x128xf32>
    %9 = arith.truncf %8 : vector<64x128xf32> to vector<64x128xbf16>
    %c0_9 = arith.constant 0 : index
    %c0_10 = arith.constant 0 : index
    %c0_11 = arith.constant 0 : index
    %10 = vector.load %arg3[%c0_9, %c0_10, %c0_11] : memref<5x128x128xbf16, #tpu.memory_space<vmem>>, vector<1x128x128xbf16>
    %11 = vector.shape_cast %10 : vector<1x128x128xbf16> to vector<128x128xbf16>
    %cst_12 = arith.constant dense<0.000000e+00> : vector<64x128xf32>
    %12 = tpu.matmul %9, %11, %cst_12 {dimension_numbers = #tpu.dot_dimension_numbers<[1], [0], [0], [1], [0, 0, 1, 1], [], []>} : vector<64x128xbf16>, vector<128x128xbf16>, vector<64x128xf32> -> vector<64x128xf32>
    %13 = arith.addf %4, %12 : vector<64x128xf32>
    %c0_13 = arith.constant 0 : index
    %c0_14 = arith.constant 0 : index
    %c0_15 = arith.constant 0 : index
    %14 = vector.load %arg4[%c0_13, %c0_14, %c0_15] : memref<5x1x128xf32, #tpu.memory_space<vmem>>, vector<1x1x128xf32>
    %15 = vector.shape_cast %14 : vector<1x1x128xf32> to vector<1x128xf32>
    %16 = vector.broadcast %15 : vector<1x128xf32> to vector<64x128xf32>
    %17 = arith.addf %13, %16 : vector<64x128xf32>
    %cst_16 = arith.constant 0.000000e+00 : f32
    %18 = vector.broadcast %cst_16 : f32 to vector<64x128xf32>
    %19 = arith.maximumf %17, %18 : vector<64x128xf32>
    %20 = arith.truncf %19 : vector<64x128xf32> to vector<64x128xbf16>
    %c1 = arith.constant 1 : index
    %c0_17 = arith.constant 0 : index
    %c0_18 = arith.constant 0 : index
    %21 = vector.load %arg2[%c1, %c0_17, %c0_18] : memref<5x128x128xbf16, #tpu.memory_space<vmem>>, vector<1x128x128xbf16>
    %22 = vector.shape_cast %21 : vector<1x128x128xbf16> to vector<128x128xbf16>
    %cst_19 = arith.constant dense<0.000000e+00> : vector<64x128xf32>
    %23 = tpu.matmul %20, %22, %cst_19 {dimension_numbers = #tpu.dot_dimension_numbers<[1], [0], [0], [1], [0, 0, 1, 1], [], []>} : vector<64x128xbf16>, vector<128x128xbf16>, vector<64x128xf32> -> vector<64x128xf32>
    %cst_20 = arith.constant dense<0.000000e+00> : vector<64x128xf32>
    %24 = tpu.matmul %5, %20, %cst_20 {dimension_numbers = #tpu.dot_dimension_numbers<[1], [0], [0], [1], [0, 0, 1, 1], [], []>} : vector<64x64xbf16>, vector<64x128xbf16>, vector<64x128xf32> -> vector<64x128xf32>
    %25 = vector.broadcast %1 : vector<64x1xf32> to vector<64x128xf32>
    %26 = arith.mulf %24, %25 : vector<64x128xf32>
    %27 = arith.truncf %26 : vector<64x128xf32> to vector<64x128xbf16>
    %c1_21 = arith.constant 1 : index
    %c0_22 = arith.constant 0 : index
    %c0_23 = arith.constant 0 : index
    %28 = vector.load %arg3[%c1_21, %c0_22, %c0_23] : memref<5x128x128xbf16, #tpu.memory_space<vmem>>, vector<1x128x128xbf16>
    %29 = vector.shape_cast %28 : vector<1x128x128xbf16> to vector<128x128xbf16>
    %cst_24 = arith.constant dense<0.000000e+00> : vector<64x128xf32>
    %30 = tpu.matmul %27, %29, %cst_24 {dimension_numbers = #tpu.dot_dimension_numbers<[1], [0], [0], [1], [0, 0, 1, 1], [], []>} : vector<64x128xbf16>, vector<128x128xbf16>, vector<64x128xf32> -> vector<64x128xf32>
    %31 = arith.addf %23, %30 : vector<64x128xf32>
    %c1_25 = arith.constant 1 : index
    %c0_26 = arith.constant 0 : index
    %c0_27 = arith.constant 0 : index
    %32 = vector.load %arg4[%c1_25, %c0_26, %c0_27] : memref<5x1x128xf32, #tpu.memory_space<vmem>>, vector<1x1x128xf32>
    %33 = vector.shape_cast %32 : vector<1x1x128xf32> to vector<1x128xf32>
    %34 = vector.broadcast %33 : vector<1x128xf32> to vector<64x128xf32>
    %35 = arith.addf %31, %34 : vector<64x128xf32>
    %cst_28 = arith.constant 0.000000e+00 : f32
    %36 = vector.broadcast %cst_28 : f32 to vector<64x128xf32>
    %37 = arith.maximumf %35, %36 : vector<64x128xf32>
    %38 = arith.truncf %37 : vector<64x128xf32> to vector<64x128xbf16>
    %c2 = arith.constant 2 : index
    %c0_29 = arith.constant 0 : index
    %c0_30 = arith.constant 0 : index
    %39 = vector.load %arg2[%c2, %c0_29, %c0_30] : memref<5x128x128xbf16, #tpu.memory_space<vmem>>, vector<1x128x128xbf16>
    %40 = vector.shape_cast %39 : vector<1x128x128xbf16> to vector<128x128xbf16>
    %cst_31 = arith.constant dense<0.000000e+00> : vector<64x128xf32>
    %41 = tpu.matmul %38, %40, %cst_31 {dimension_numbers = #tpu.dot_dimension_numbers<[1], [0], [0], [1], [0, 0, 1, 1], [], []>} : vector<64x128xbf16>, vector<128x128xbf16>, vector<64x128xf32> -> vector<64x128xf32>
    %cst_32 = arith.constant dense<0.000000e+00> : vector<64x128xf32>
    %42 = tpu.matmul %5, %38, %cst_32 {dimension_numbers = #tpu.dot_dimension_numbers<[1], [0], [0], [1], [0, 0, 1, 1], [], []>} : vector<64x64xbf16>, vector<64x128xbf16>, vector<64x128xf32> -> vector<64x128xf32>
    %43 = vector.broadcast %1 : vector<64x1xf32> to vector<64x128xf32>
    %44 = arith.mulf %42, %43 : vector<64x128xf32>
    %45 = arith.truncf %44 : vector<64x128xf32> to vector<64x128xbf16>
    %c2_33 = arith.constant 2 : index
    %c0_34 = arith.constant 0 : index
    %c0_35 = arith.constant 0 : index
    %46 = vector.load %arg3[%c2_33, %c0_34, %c0_35] : memref<5x128x128xbf16, #tpu.memory_space<vmem>>, vector<1x128x128xbf16>
    %47 = vector.shape_cast %46 : vector<1x128x128xbf16> to vector<128x128xbf16>
    %cst_36 = arith.constant dense<0.000000e+00> : vector<64x128xf32>
    %48 = tpu.matmul %45, %47, %cst_36 {dimension_numbers = #tpu.dot_dimension_numbers<[1], [0], [0], [1], [0, 0, 1, 1], [], []>} : vector<64x128xbf16>, vector<128x128xbf16>, vector<64x128xf32> -> vector<64x128xf32>
    %49 = arith.addf %41, %48 : vector<64x128xf32>
    %c2_37 = arith.constant 2 : index
    %c0_38 = arith.constant 0 : index
    %c0_39 = arith.constant 0 : index
    %50 = vector.load %arg4[%c2_37, %c0_38, %c0_39] : memref<5x1x128xf32, #tpu.memory_space<vmem>>, vector<1x1x128xf32>
    %51 = vector.shape_cast %50 : vector<1x1x128xf32> to vector<1x128xf32>
    %52 = vector.broadcast %51 : vector<1x128xf32> to vector<64x128xf32>
    %53 = arith.addf %49, %52 : vector<64x128xf32>
    %cst_40 = arith.constant 0.000000e+00 : f32
    %54 = vector.broadcast %cst_40 : f32 to vector<64x128xf32>
    %55 = arith.maximumf %53, %54 : vector<64x128xf32>
    %56 = arith.truncf %55 : vector<64x128xf32> to vector<64x128xbf16>
    %c3 = arith.constant 3 : index
    %c0_41 = arith.constant 0 : index
    %c0_42 = arith.constant 0 : index
    %57 = vector.load %arg2[%c3, %c0_41, %c0_42] : memref<5x128x128xbf16, #tpu.memory_space<vmem>>, vector<1x128x128xbf16>
    %58 = vector.shape_cast %57 : vector<1x128x128xbf16> to vector<128x128xbf16>
    %cst_43 = arith.constant dense<0.000000e+00> : vector<64x128xf32>
    %59 = tpu.matmul %56, %58, %cst_43 {dimension_numbers = #tpu.dot_dimension_numbers<[1], [0], [0], [1], [0, 0, 1, 1], [], []>} : vector<64x128xbf16>, vector<128x128xbf16>, vector<64x128xf32> -> vector<64x128xf32>
    %cst_44 = arith.constant dense<0.000000e+00> : vector<64x128xf32>
    %60 = tpu.matmul %5, %56, %cst_44 {dimension_numbers = #tpu.dot_dimension_numbers<[1], [0], [0], [1], [0, 0, 1, 1], [], []>} : vector<64x64xbf16>, vector<64x128xbf16>, vector<64x128xf32> -> vector<64x128xf32>
    %61 = vector.broadcast %1 : vector<64x1xf32> to vector<64x128xf32>
    %62 = arith.mulf %60, %61 : vector<64x128xf32>
    %63 = arith.truncf %62 : vector<64x128xf32> to vector<64x128xbf16>
    %c3_45 = arith.constant 3 : index
    %c0_46 = arith.constant 0 : index
    %c0_47 = arith.constant 0 : index
    %64 = vector.load %arg3[%c3_45, %c0_46, %c0_47] : memref<5x128x128xbf16, #tpu.memory_space<vmem>>, vector<1x128x128xbf16>
    %65 = vector.shape_cast %64 : vector<1x128x128xbf16> to vector<128x128xbf16>
    %cst_48 = arith.constant dense<0.000000e+00> : vector<64x128xf32>
    %66 = tpu.matmul %63, %65, %cst_48 {dimension_numbers = #tpu.dot_dimension_numbers<[1], [0], [0], [1], [0, 0, 1, 1], [], []>} : vector<64x128xbf16>, vector<128x128xbf16>, vector<64x128xf32> -> vector<64x128xf32>
    %67 = arith.addf %59, %66 : vector<64x128xf32>
    %c3_49 = arith.constant 3 : index
    %c0_50 = arith.constant 0 : index
    %c0_51 = arith.constant 0 : index
    %68 = vector.load %arg4[%c3_49, %c0_50, %c0_51] : memref<5x1x128xf32, #tpu.memory_space<vmem>>, vector<1x1x128xf32>
    %69 = vector.shape_cast %68 : vector<1x1x128xf32> to vector<1x128xf32>
    %70 = vector.broadcast %69 : vector<1x128xf32> to vector<64x128xf32>
    %71 = arith.addf %67, %70 : vector<64x128xf32>
    %cst_52 = arith.constant 0.000000e+00 : f32
    %72 = vector.broadcast %cst_52 : f32 to vector<64x128xf32>
    %73 = arith.maximumf %71, %72 : vector<64x128xf32>
    %74 = arith.truncf %73 : vector<64x128xf32> to vector<64x128xbf16>
    %c4 = arith.constant 4 : index
    %c0_53 = arith.constant 0 : index
    %c0_54 = arith.constant 0 : index
    %75 = vector.load %arg2[%c4, %c0_53, %c0_54] : memref<5x128x128xbf16, #tpu.memory_space<vmem>>, vector<1x128x128xbf16>
    %76 = vector.shape_cast %75 : vector<1x128x128xbf16> to vector<128x128xbf16>
    %cst_55 = arith.constant dense<0.000000e+00> : vector<64x128xf32>
    %77 = tpu.matmul %74, %76, %cst_55 {dimension_numbers = #tpu.dot_dimension_numbers<[1], [0], [0], [1], [0, 0, 1, 1], [], []>} : vector<64x128xbf16>, vector<128x128xbf16>, vector<64x128xf32> -> vector<64x128xf32>
    %cst_56 = arith.constant dense<0.000000e+00> : vector<64x128xf32>
    %78 = tpu.matmul %5, %74, %cst_56 {dimension_numbers = #tpu.dot_dimension_numbers<[1], [0], [0], [1], [0, 0, 1, 1], [], []>} : vector<64x64xbf16>, vector<64x128xbf16>, vector<64x128xf32> -> vector<64x128xf32>
    %79 = vector.broadcast %1 : vector<64x1xf32> to vector<64x128xf32>
    %80 = arith.mulf %78, %79 : vector<64x128xf32>
    %81 = arith.truncf %80 : vector<64x128xf32> to vector<64x128xbf16>
    %c4_57 = arith.constant 4 : index
    %c0_58 = arith.constant 0 : index
    %c0_59 = arith.constant 0 : index
    %82 = vector.load %arg3[%c4_57, %c0_58, %c0_59] : memref<5x128x128xbf16, #tpu.memory_space<vmem>>, vector<1x128x128xbf16>
    %83 = vector.shape_cast %82 : vector<1x128x128xbf16> to vector<128x128xbf16>
    %cst_60 = arith.constant dense<0.000000e+00> : vector<64x128xf32>
    %84 = tpu.matmul %81, %83, %cst_60 {dimension_numbers = #tpu.dot_dimension_numbers<[1], [0], [0], [1], [0, 0, 1, 1], [], []>} : vector<64x128xbf16>, vector<128x128xbf16>, vector<64x128xf32> -> vector<64x128xf32>
    %85 = arith.addf %77, %84 : vector<64x128xf32>
    %c4_61 = arith.constant 4 : index
    %c0_62 = arith.constant 0 : index
    %c0_63 = arith.constant 0 : index
    %86 = vector.load %arg4[%c4_61, %c0_62, %c0_63] : memref<5x1x128xf32, #tpu.memory_space<vmem>>, vector<1x1x128xf32>
    %87 = vector.shape_cast %86 : vector<1x1x128xf32> to vector<1x128xf32>
    %88 = vector.broadcast %87 : vector<1x128xf32> to vector<64x128xf32>
    %89 = arith.addf %85, %88 : vector<64x128xf32>
    %c0_64 = arith.constant 0 : index
    %c0_65 = arith.constant 0 : index
    %90 = vector.load %arg6[%c0_64, %c0_65] : memref<64x128xf32, #tpu.memory_space<vmem>>, vector<64x128xf32>
    tpu.vector_store %arg6[%c0_64, %c0_65], %89 {strides = array<i32>} : memref<64x128xf32, #tpu.memory_space<vmem>>, vector<64x128xf32>,
    return
  }
}

</mosaic_0001>

<bundles_post_ra>
// kernel: graphsage_forward.1
= control target key start
LH: loop header
LB: loop body
LE: loop exit
PB: predicated region body
PF: predicated region fallthrough
CT: control target
= control target key end

     0   :  { %11 = vsyncpa [#allocation5], 0  ;;  %s3163_s0 = inlined_call_operand.vmem [shape: bf16[64,64], index: 0, kind: input, shape index: {}]   ;;  %s3164_s1 = inlined_call_operand.vmem [shape: bf16[64,128], index: 1, kind: input, shape index: {}]   ;;  %s3165_s2 = inlined_call_operand.hbm [shape: bf16[5,128,128], index: 2, kind: input, shape index: {}]   ;;  %s3166_s3 = inlined_call_operand.hbm [shape: bf16[5,128,128], index: 3, kind: input, shape index: {}]   ;;  %s3167_s4 = inlined_call_operand.vmem [shape: f32[5,1,128], index: 4, kind: input, shape index: {}]   ;;  %s3168_s5 = inlined_call_operand.vmem [shape: f32[64,1], index: 5, kind: input, shape index: {}]   ;;  %s3169_s6 = inlined_call_operand.vmem [shape: f32[64,128], index: 6, kind: output, shape index: {}]  }
   0x1   :  { %12 = vsyncpa [#allocation7], 0  ;;  %s2800_s21 = smov [#allocation4]   ;;  %s2750_s25 = scalar_lea.hbm %s3165_s2, 5120 }
   0x2   :  { %s20_s22 = sshll.u32 %s2800_s21, 4  ;;  %p2751_p0 = scmp.ne.s32.totalorder %s3165_s2, %s2750_s25  ;;  %s21_s22 = int_to_ptr.vmem [resolvable:$true] %s20_s22 }
   0x3   :  { %p2754_p1 = scmp.lt.u32.totalorder %s2750_s25, %s3165_s2 }
   0x5   :  { %p2756_p2 = pnand %p2754_p1, %p2751_p0 }
   0x7   :  { %2759 = shalt.err (!%p2756_p2)
}
   0x8   :  { %s2760_s30 = scalar_lea.vmem %s21_s22, 5120  ;;  %p2765_p4 = scmp.lt.s32.totalorder %s21_s22, %s21_s22 }
   0x9   :  { %p2761_p3 = scmp.ne.s32.totalorder %s21_s22, %s2760_s30  ;;  %p2766_p5 = scmp.lt.s32.totalorder %s2760_s30, %s2760_s30 }
   0xb   :  { %p2767_p6 = por %p2766_p5, %p2765_p4 }
   0xd   :  { %p2768_p7 = pnand %p2767_p6, %p2761_p3 }
   0xf   :  { %2771 = shalt.err (!%p2768_p7)
}
  0x10   :  { %s2801_s7 = smov 64   ;;  %s2802_s8 = smov 4  }
  0x11   :  { %26 = dma.hbm_to_vmem [thread:$0]  %s3165_s2, 5120, %s21_s22, [#allocation5], %s2801_s7, %s2801_s7, %s2802_s8  }
  0x12   :  { %s2803_s11 = smov [#allocation6]   ;;  %s2772_s15 = scalar_lea.hbm %s3166_s3, 5120 }
  0x13   :  { %s32_s12 = sshll.u32 %s2803_s11, 4  ;;  %p2773_p8 = scmp.ne.s32.totalorder %s3166_s3, %s2772_s15  ;;  %s33_s12 = int_to_ptr.vmem [resolvable:$true] %s32_s12 }
  0x14   :  { %p2776_p9 = scmp.lt.u32.totalorder %s2772_s15, %s3166_s3 }
  0x16   :  { %p2778_p10 = pnand %p2776_p9, %p2773_p8 }
  0x18   :  { %2781 = shalt.err (!%p2778_p10)
}
  0x19   :  { %s2782_s20 = scalar_lea.vmem %s33_s12, 5120  ;;  %p2787_p12 = scmp.lt.s32.totalorder %s33_s12, %s33_s12 }
  0x1a   :  { %p2783_p11 = scmp.ne.s32.totalorder %s33_s12, %s2782_s20  ;;  %p2788_p13 = scmp.lt.s32.totalorder %s2782_s20, %s2782_s20 }
  0x1c   :  { %p2789_p0 = por %p2788_p13, %p2787_p12 }
  0x1e   :  { %p2790_p1 = pnand %p2789_p0, %p2783_p11 }
  0x20   :  { %2793 = shalt.err (!%p2790_p1)
}
  0x21   :  { %38 = dma.hbm_to_vmem [thread:$0]  %s3166_s3, 5120, %s33_s12, [#allocation7], %s2801_s7, %s2801_s7, %s2802_s8  }
  0x22   :  { %2794 = dma.done.wait [#allocation5], 5120  }
  0x23   :  { %2795 = vsyncadd [#allocation5], 4294962176 }
  0x24   :  { %2796 = dma.done.wait [#allocation7], 5120  }
  0x25   :  { %2797 = vsyncadd [#allocation7], 4294962176  ;;  %v2867_v0 = vld [vmem:[%s3163_s0] sm:$0xff]  ;;  %v2872_v1 = vld [vmem:[%s3163_s0 + $0x8] sm:$0xff] }
  0x26   :  { %v2877_v2 = vld [vmem:[%s3163_s0 + $0x10] sm:$0xff]  ;;  %v2882_v3 = vld [vmem:[%s3163_s0 + $0x18] sm:$0xff] }
  0x27   :  { %97 = vsyncadd [#allocation3], 512  ;;  %v98_v4 = vld [vmem:[%s3164_s1] sm:$0xf]  ;;  %v99_v5 = vld [vmem:[%s3164_s1 + $0x4] sm:$0xf] }
  0x28   :  { %v100_v6 = vld [vmem:[%s3164_s1 + $0x8] sm:$0xf]  ;;  %v101_v7 = vld [vmem:[%s3164_s1 + $0xc] sm:$0xf]  ;;  %v102_v8 = vld [vmem:[%s3164_s1 + $0x10] sm:$0xf]  ;;  %v2037_v36 = vcombine.low %v98_v4, %v99_v5 }
  0x29   :  { %v103_v9 = vld [vmem:[%s3164_s1 + $0x14] sm:$0xf]  ;;  %v104_v10 = vld [vmem:[%s3164_s1 + $0x18] sm:$0xf]  ;;  %v105_v11 = vld [vmem:[%s3164_s1 + $0x1c] sm:$0xf]  ;;  %v2936_v37 = vcombine.low %v100_v6, %v101_v7 }
  0x2a   :  { %v106_v12 = vld [vmem:[%s3168_s5] sm:$0xff]  ;;  %v107_v13 = vld [vmem:[%s3168_s5 + $0x8] sm:$0xff]  ;;  %v108_v14 = vld [vmem:[%s3168_s5 + $0x10] sm:$0xff] }
  0x2b   :  { %v109_v15 = vld [vmem:[%s3168_s5 + $0x18] sm:$0xff]  ;;  %v110_v16 = vld [vmem:[%s3168_s5 + $0x20] sm:$0xff]  ;;  %v111_v17 = vld [vmem:[%s3168_s5 + $0x28] sm:$0xff] }
  0x2c   :  { %v112_v18 = vld [vmem:[%s3168_s5 + $0x30] sm:$0xff]  ;;  %v113_v19 = vld [vmem:[%s3168_s5 + $0x38] sm:$0xff]  ;;  %v114_v20 = vld [vmem:[#allocation4] sm:$0xf] }
  0x2d   :  { %v115_v21 = vld [vmem:[#allocation4 + $0x4] sm:$0xf]  ;;  %v116_v22 = vld [vmem:[#allocation4 + $0x8] sm:$0xf]  ;;  %v117_v23 = vld [vmem:[#allocation4 + $0xc] sm:$0xf] }
  0x2e   :  { %v118_v24 = vld [vmem:[#allocation4 + $0x10] sm:$0xf]  ;;  %v119_v25 = vld [vmem:[#allocation4 + $0x14] sm:$0xf]  ;;  %v120_v26 = vld [vmem:[#allocation4 + $0x18] sm:$0xf] }
  0x2f   :  { %v121_v27 = vld [vmem:[#allocation4 + $0x1c] sm:$0xf]  ;;  %v122_v28 = vld [vmem:[#allocation4 + $0x20] sm:$0xf]  ;;  %v123_v29 = vld [vmem:[#allocation4 + $0x24] sm:$0xf] }
  0x30   :  { %v124_v30 = vld [vmem:[#allocation4 + $0x28] sm:$0xf]  ;;  %v125_v31 = vld [vmem:[#allocation4 + $0x2c] sm:$0xf]  ;;  %v126_v32 = vld [vmem:[#allocation4 + $0x30] sm:$0xf] }
  0x31   :  { %v127_v33 = vld [vmem:[#allocation4 + $0x34] sm:$0xf]  ;;  %v2932_v34 = vld [vmem:[#allocation4 + $0x38] sm:$0xf]  ;;  %v2934_v35 = vld [vmem:[#allocation4 + $0x3c] sm:$0xf] }
  0x32   :  { %2798 = dma.done.wait [#allocation3], 512 }
  0x33   :  { %2799 = vsyncadd [#allocation3], 4294966784  ;;  %vm162_vm0 = vcmask 523264   ;;  %2311 = vmatprep.subr.bf16.mxu0 %v2037_v36  ;;  %v2053_v38 = vcombine.low %v114_v20, %v115_v21  ;;  %v2804_v39 = vmov 0   ;;  %v2941_v40 = vcombine.low %v102_v8, %v103_v9  ;;  %2367 = vmatprep.mubr.bf16.mxu1 %v2037_v36  ;;  %v2678_v44 = vld [vmem:[#allocation6] sm:$0xff]   ;;  %v2679_v46 = vld [vmem:[#allocation6 + $0x8] sm:$0xff]  }
  0x34   :  { %2319 = vmatprep.mubr.msk.bf16.mxu0 %vm162_vm0, %v2867_v0  ;;  %2312 = vmatpush3.bf16.msra.mxu0 %v2037_v36  ;;  %v2054_v41 = vcombine.low %v116_v22, %v117_v23  ;;  %v2040_v42 = vcombine.low %v104_v10, %v105_v11  ;;  %v2055_v43 = vcombine.low %v118_v24, %v119_v25  ;;  %v2680_v48 = vld [vmem:[#allocation6 + $0x10] sm:$0xff]   ;;  %v2681_v50 = vld [vmem:[#allocation6 + $0x18] sm:$0xff]   ;;  %v2682_v52 = vld [vmem:[#allocation6 + $0x20] sm:$0xff]  }
  0x35   :  { %2676 = vset.pattern.permute.xlu0 %v2804_v39  ;;  %2313 = vmatprep.subr.bf16.mxu0 %v2936_v37  ;;  %v2056_v45 = vcombine.low %v120_v26, %v121_v27  ;;  %v2057_v47 = vcombine.low %v122_v28, %v123_v29  ;;  %v2058_v49 = vcombine.low %v124_v30, %v125_v31  ;;  %v2683_v53 = vld [vmem:[#allocation6 + $0x28] sm:$0xff]   ;;  %v2684_v54 = vld [vmem:[#allocation6 + $0x30] sm:$0xff]   ;;  %v2685_v56 = vld [vmem:[#allocation6 + $0x38] sm:$0xff]  }
  0x36   :  { %2677 = vset.pattern.permute.xlu1 %v2804_v39  ;;  %242 = vperm.xlu0 %2676, %v106_v12   ;;  %v2059_v51 = vcombine.low %v126_v32, %v127_v33  ;;  %v2060_v55 = vcombine.low %v2932_v34, %v2934_v35  ;;  %v2061_v34 = vld [vmem:[%s3167_s4] ss:$0 sm:$0xff] }
  0x37   :  { %252 = vperm.xlu1 %2677, %v108_v14   ;;  %2351 = vmatprep.subr.bf16.mxu1 %v2053_v38 }
  0x38   :  { %2314 = vmatpush3.bf16.msra.mxu0 %v2936_v37  ;;  %2352 = vmatpush3.bf16.msra.mxu1 %v2053_v38 }
  0x39   :  { %2315 = vmatprep.subr.bf16.mxu0 %v2941_v40  ;;  %2353 = vmatprep.subr.bf16.mxu1 %v2054_v41 }
  0x3a   :  { %247 = vperm.xlu0 %2676, %v107_v13  }
  0x3b   :  { %257 = vperm.xlu1 %2677, %v109_v15  }
  0x3c   :  { %2316 = vmatpush3.bf16.msra.mxu0 %v2941_v40  ;;  %2354 = vmatpush3.bf16.msra.mxu1 %v2054_v41 }
  0x3d   :  { %2317 = vmatprep.subr.bf16.mxu0 %v2040_v42  ;;  %2355 = vmatprep.subr.bf16.mxu1 %v2055_v43 }
  0x3e   :  { %262 = vperm.xlu0 %2676, %v110_v16  }
  0x3f   :  { %267 = vperm.xlu1 %2677, %v111_v17  }
  0x40   :  { %2318 = vmatpush3.bf16.msra.mxu0 %v2040_v42  ;;  %2356 = vmatpush3.bf16.msra.mxu1 %v2055_v43 }
  0x41   :  { %2327 = vmatprep.subr.bf16.mxu0 %v2678_v44  ;;  %2357 = vmatprep.subr.bf16.mxu1 %v2056_v45 }
  0x42   :  { %272 = vperm.xlu0 %2676, %v112_v18  }
  0x43   :  { %277 = vperm.xlu1 %2677, %v113_v19   ;;  %2320 = vmatmul.mubr.msk.bf16.vlgmr.msra.gmra.mrb[0].mxu0 %vm162_vm0, %v2872_v1 }
  0x44   :  { %2323 = vmatprep.mubr.msk.bf16.mxu0 %vm162_vm0, %v2877_v2  ;;  %2328 = vmatpush3.bf16.msra.mxu0 %v2678_v44 }
  0x45   :  { %2329 = vmatprep.subr.bf16.mxu0 %v2679_v46  ;;  %2358 = vmatpush3.bf16.msra.mxu1 %v2056_v45 }
  0x46   :  { %2359 = vmatprep.subr.bf16.mxu1 %v2057_v47 }
  0x48   :  { %2330 = vmatpush3.bf16.msra.mxu0 %v2679_v46 }
  0x49   :  { %2331 = vmatprep.subr.bf16.mxu0 %v2680_v48  ;;  %2360 = vmatpush3.bf16.msra.mxu1 %v2057_v47 }
  0x4a   :  { %2361 = vmatprep.subr.bf16.mxu1 %v2058_v49 }
  0x4b   :  { %2324 = vmatmul.mubr.msk.bf16.gmra.mrb[4].mxu0 %vm162_vm0, %v2882_v3 }
  0x4c   :  { %2332 = vmatpush3.bf16.msra.mxu0 %v2680_v48 }
  0x4d   :  { %2333 = vmatprep.subr.bf16.mxu0 %v2681_v50  ;;  %2362 = vmatpush3.bf16.msra.mxu1 %v2058_v49 }
  0x4e   :  { %2363 = vmatprep.subr.bf16.mxu1 %v2059_v51 }
  0x50   :  { %2334 = vmatpush3.bf16.msra.mxu0 %v2681_v50 }
  0x51   :  { %2335 = vmatprep.subr.bf16.mxu0 %v2682_v52  ;;  %2364 = vmatpush3.bf16.msra.mxu1 %v2059_v51 }
  0x52   :  { %2365 = vmatprep.subr.bf16.mxu1 %v2060_v55 }
  0x54   :  { %2336 = vmatpush3.bf16.msra.mxu0 %v2682_v52 }
  0x55   :  { %2337 = vmatprep.subr.bf16.mxu0 %v2683_v53  ;;  %2366 = vmatpush3.bf16.msra.mxu1 %v2060_v55 }
  0x58   :  { %2338 = vmatpush3.bf16.msra.mxu0 %v2683_v53  ;;  %2368 = vmatmul.mubr.bf16.vlgmr.msra.gmra.mrb[0].mxu1 %v2936_v37 }
  0x59   :  { %2339 = vmatprep.subr.bf16.mxu0 %v2684_v54  ;;  %2371 = vmatprep.mubr.bf16.mxu1 %v2941_v40 }
  0x5c   :  { %2340 = vmatpush3.bf16.msra.mxu0 %v2684_v54 }
  0x5d   :  { %2341 = vmatprep.subr.bf16.mxu0 %v2685_v56 }
  0x60   :  { %2342 = vmatpush3.bf16.msra.mxu0 %v2685_v56  ;;  %2372 = vmatmul.mubr.bf16.gmra.mrb[4].mxu1 %v2040_v42 }
  0x61   :  { %2447 = vmatprep.mubr.msk.bf16.mxu1 %vm162_vm0, %v2867_v0 }
  0xb5   :  { %v2958_v57 = vpop.permute.xlu0 %242 }
  0xb6   :  { %v2960_v58 = vpop.permute.xlu1 %252 }
  0xb9   :  { %v2962_v59 = vpop.permute.xlu0 %247 }
  0xba   :  { %v2964_v60 = vpop.permute.xlu1 %257 }
  0xbd   :  { %v2966_v4 = vpop.permute.xlu0 %262 }
  0xbe   :  { %v2970_v8 = vpop.permute.xlu1 %267 }
  0xc1   :  { %v2974_v14 = vpop.permute.xlu0 %272 }
  0xc2   :  { %v2976_v16 = vpop.permute.xlu1 %277 }
 0x116   :  { %v2321_v61 = vpop.f32.mrb[0].mxu0 }
 0x117   :  { %v209_v62 = vpop.f32.mrb[1].mxu0  ;;  %v282_v5 = vmul.f32 %v2321_v61, %v2960_v58 }
 0x118   :  { %v2322_v63 = vpop.f32.mrb[2].mxu0  ;;  %v280_v9 = vmul.f32 %v2958_v57, %v209_v62 }
 0x119   :  { %v283_v6 = vmul.f32 %v2322_v63, %v2964_v60  ;;  %v212_v7 = vpop.f32.mrb[3].mxu0 }
 0x11a   :  { %v281_v10 = vmul.f32 %v2962_v59, %v212_v7 }
 0x11b   :  { %v289_v11 = vpack.c.bf16 %v283_v6, %v282_v5 }
 0x11c   :  { %v288_v12 = vpack.c.bf16 %v281_v10, %v280_v9 }
 0x11e   :  { %v2325_v13 = vpop.f32.mrb[4].mxu0  ;;  %2343 = vmatprep.mubr.bf16.mxu0 %v288_v12 }
 0x11f   :  { %v225_v15 = vpop.f32.mrb[5].mxu0  ;;  %2344 = vmatmul.mubr.bf16.vlgmr.msra.gmra.mrb[8].mxu0 %v289_v11  ;;  %v286_v18 = vmul.f32 %v2325_v13, %v2974_v14 }
 0x120   :  { %v2326_v17 = vpop.f32.mrb[6].mxu0  ;;  %v284_v21 = vmul.f32 %v2966_v4, %v225_v15 }
 0x121   :  { %v287_v19 = vmul.f32 %v2326_v17, %v2976_v16  ;;  %v228_v20 = vpop.f32.mrb[7].mxu0 }
 0x122   :  { %v285_v22 = vmul.f32 %v2970_v8, %v228_v20  ;;  %v2688_v20 = vld [vmem:[#allocation6 + $0x50] sm:$0xff]  }
 0x123   :  { %v291_v23 = vpack.c.bf16 %v287_v19, %v286_v18  ;;  %v2686_v18 = vld [vmem:[#allocation6 + $0x40] sm:$0xff]   ;;  %v2687_v19 = vld [vmem:[#allocation6 + $0x48] sm:$0xff]  }
 0x124   :  { %v290_v24 = vpack.c.bf16 %v285_v22, %v284_v21  ;;  %v2689_v21 = vld [vmem:[#allocation6 + $0x58] sm:$0xff]   ;;  %v2690_v22 = vld [vmem:[#allocation6 + $0x60] sm:$0xff]  }
 0x126   :  { %2347 = vmatprep.mubr.bf16.mxu0 %v290_v24  ;;  %v2692_v24 = vld [vmem:[#allocation6 + $0x70] sm:$0xff]  }
 0x127   :  { %2348 = vmatmul.mubr.bf16.gmra.mrb[12].mxu0 %v291_v23  ;;  %v2691_v23 = vld [vmem:[#allocation6 + $0x68] sm:$0xff]  }
 0x128   :  { %2383 = vmatprep.mubr.msk.bf16.mxu0 %vm162_vm0, %v2867_v0 }
 0x12b   :  { %v2369_v25 = vpop.f32.mrb[0].mxu1 }
 0x12c   :  { %v503_v26 = vpop.f32.mrb[1].mxu1 }
 0x12d   :  { %v2370_v27 = vpop.f32.mrb[2].mxu1 }
 0x12e   :  { %v506_v28 = vpop.f32.mrb[3].mxu1 }
 0x133   :  { %v2373_v29 = vpop.f32.mrb[4].mxu1 }
 0x134   :  { %v519_v30 = vpop.f32.mrb[5].mxu1 }
 0x135   :  { %v2374_v31 = vpop.f32.mrb[6].mxu1 }
 0x136   :  { %v522_v32 = vpop.f32.mrb[7].mxu1 }
 0x1f2   :  { %v2345_v33 = vpop.f32.mrb[8].mxu0 }
 0x1f3   :  { %v512_v35 = vadd.f32 %v2369_v25, %v2345_v33  ;;  %v390_v36 = vpop.f32.mrb[9].mxu0  ;;  %v2693_v25 = vld [vmem:[#allocation6 + $0x78] sm:$0xff]  }
 0x1f4   :  { %v504_v37 = vadd.f32 %v503_v26, %v390_v36  ;;  %v2346_v38 = vpop.f32.mrb[10].mxu0  ;;  %v2694_v26 = vld [vmem:[#allocation4 + $0x40] sm:$0xff]  }
 0x1f5   :  { %v543_v39 = vadd.f32 %v2061_v34, %v512_v35  ;;  %v515_v40 = vadd.f32 %v2370_v27, %v2346_v38  ;;  %v393_v41 = vpop.f32.mrb[11].mxu0 }
 0x1f6   :  { %v541_v42 = vadd.f32 %v2061_v34, %v504_v37  ;;  %v507_v43 = vadd.f32 %v506_v28, %v393_v41  ;;  %v2695_v37 = vld [vmem:[#allocation4 + $0x48] sm:$0xff]  }
 0x1f7   :  { %v544_v44 = vadd.f32 %v2061_v34, %v515_v40  ;;  %v551_v46 = vmax.f32 %v543_v39, 0.0 }
 0x1f8   :  { %v542_v45 = vadd.f32 %v2061_v34, %v507_v43  ;;  %v549_v48 = vmax.f32 %v541_v42, 0.0 }
 0x1f9   :  { %v552_v47 = vmax.f32 %v544_v44, 0.0  ;;  %v2696_v44 = vld [vmem:[#allocation4 + $0x50] sm:$0xff]  }
 0x1fa   :  { %v550_v49 = vmax.f32 %v542_v45, 0.0  ;;  %v2349_v50 = vpop.f32.mrb[12].mxu0 }
 0x1fb   :  { %v528_v51 = vadd.f32 %v2373_v29, %v2349_v50  ;;  %v406_v52 = vpop.f32.mrb[13].mxu0  ;;  %v2987_v53 = vpack.c.bf16 %v552_v47, %v551_v46  ;;  %v2698_v50 = vld [vmem:[#allocation4 + $0x60] sm:$0xff]  }
 0x1fc   :  { %v520_v54 = vadd.f32 %v519_v30, %v406_v52  ;;  %v2350_v55 = vpop.f32.mrb[14].mxu0  ;;  %v2989_v56 = vpack.c.bf16 %v550_v49, %v549_v48  ;;  %v2697_v49 = vld [vmem:[#allocation4 + $0x58] sm:$0xff]   ;;  %v2700_v52 = vld [vmem:[#allocation4 + $0x70] sm:$0xff]  }
 0x1fd   :  { %v547_v61 = vadd.f32 %v2061_v34, %v528_v51  ;;  %v531_v62 = vadd.f32 %v2374_v31, %v2350_v55  ;;  %v409_v63 = vpop.f32.mrb[15].mxu0  ;;  %v2699_v51 = vld [vmem:[#allocation4 + $0x68] sm:$0xff]   ;;  %v2083_v55 = vld [vmem:[%s3167_s4 + $0x1] ss:$0 sm:$0xff] }
 0x1fe   :  { %v545_v5 = vadd.f32 %v2061_v34, %v520_v54  ;;  %v523_v6 = vadd.f32 %v522_v32, %v409_v63  ;;  %2375 = vmatprep.subr.bf16.mxu0 %v2989_v56  ;;  %v2701_v54 = vld [vmem:[#allocation4 + $0x78] sm:$0xff]  }
 0x1ff   :  { %v548_v7 = vadd.f32 %v2061_v34, %v531_v62  ;;  %2376 = vmatpush3.bf16.msra.mxu0 %v2989_v56  ;;  %v555_v10 = vmax.f32 %v547_v61, 0.0 }
 0x200   :  { %v546_v9 = vadd.f32 %v2061_v34, %v523_v6  ;;  %2377 = vmatprep.subr.bf16.mxu0 %v2987_v53  ;;  %v553_v12 = vmax.f32 %v545_v5, 0.0 }
 0x201   :  { %v556_v11 = vmax.f32 %v548_v7, 0.0 }
 0x202   :  { %v554_v13 = vmax.f32 %v546_v9, 0.0 }
 0x203   :  { %2378 = vmatpush3.bf16.msra.mxu0 %v2987_v53  ;;  %v2995_v15 = vpack.c.bf16 %v556_v11, %v555_v10 }
 0x204   :  { %v2997_v17 = vpack.c.bf16 %v554_v13, %v553_v12 }
 0x206   :  { %2379 = vmatprep.subr.bf16.mxu0 %v2997_v17 }
 0x207   :  { %2380 = vmatpush3.bf16.msra.mxu0 %v2997_v17 }
 0x208   :  { %2381 = vmatprep.subr.bf16.mxu0 %v2995_v15 }
 0x20b   :  { %2382 = vmatpush3.bf16.msra.mxu0 %v2995_v15 }
 0x20c   :  { %2391 = vmatprep.subr.bf16.mxu0 %v2686_v18 }
 0x20e   :  { %2384 = vmatmul.mubr.msk.bf16.vlgmr.msra.gmra.mrb[16].mxu0 %vm162_vm0, %v2872_v1 }
 0x20f   :  { %2387 = vmatprep.mubr.msk.bf16.mxu0 %vm162_vm0, %v2877_v2  ;;  %2392 = vmatpush3.bf16.msra.mxu0 %v2686_v18 }
 0x210   :  { %2393 = vmatprep.subr.bf16.mxu0 %v2687_v19 }
 0x213   :  { %2394 = vmatpush3.bf16.msra.mxu0 %v2687_v19 }
 0x214   :  { %2395 = vmatprep.subr.bf16.mxu0 %v2688_v20 }
 0x216   :  { %2388 = vmatmul.mubr.msk.bf16.gmra.mrb[20].mxu0 %vm162_vm0, %v2882_v3 }
 0x217   :  { %2396 = vmatpush3.bf16.msra.mxu0 %v2688_v20 }
 0x218   :  { %2397 = vmatprep.subr.bf16.mxu0 %v2689_v21 }
 0x21b   :  { %2398 = vmatpush3.bf16.msra.mxu0 %v2689_v21 }
 0x21c   :  { %2399 = vmatprep.subr.bf16.mxu0 %v2690_v22 }
 0x21f   :  { %2400 = vmatpush3.bf16.msra.mxu0 %v2690_v22 }
 0x220   :  { %2401 = vmatprep.subr.bf16.mxu0 %v2691_v23 }
 0x223   :  { %2402 = vmatpush3.bf16.msra.mxu0 %v2691_v23 }
 0x224   :  { %2403 = vmatprep.subr.bf16.mxu0 %v2692_v24 }
 0x227   :  { %2404 = vmatpush3.bf16.msra.mxu0 %v2692_v24 }
 0x228   :  { %2405 = vmatprep.subr.bf16.mxu0 %v2693_v25 }
 0x22b   :  { %2406 = vmatpush3.bf16.msra.mxu0 %v2693_v25 }
 0x22c   :  { %2415 = vmatprep.subr.bf16.mxu0 %v2694_v26 }
 0x2e1   :  { %v2385_v27 = vpop.f32.mrb[16].mxu0 }
 0x2e2   :  { %v612_v28 = vpop.f32.mrb[17].mxu0  ;;  %v645_v30 = vmul.f32 %v2385_v27, %v2960_v58 }
 0x2e3   :  { %v2386_v29 = vpop.f32.mrb[18].mxu0  ;;  %v643_v33 = vmul.f32 %v612_v28, %v2958_v57 }
 0x2e4   :  { %v646_v31 = vmul.f32 %v2386_v29, %v2964_v60  ;;  %v615_v32 = vpop.f32.mrb[19].mxu0 }
 0x2e5   :  { %v644_v34 = vmul.f32 %v615_v32, %v2962_v59  ;;  %v2703_v32 = vld [vmem:[#allocation6 + $0x88] sm:$0xff]  }
 0x2e6   :  { %v652_v35 = vpack.c.bf16 %v646_v31, %v645_v30  ;;  %v2702_v31 = vld [vmem:[#allocation6 + $0x80] sm:$0xff]  }
 0x2e7   :  { %v651_v36 = vpack.c.bf16 %v644_v34, %v643_v33  ;;  %v2704_v33 = vld [vmem:[#allocation6 + $0x90] sm:$0xff]   ;;  %v2705_v34 = vld [vmem:[#allocation6 + $0x98] sm:$0xff]  }
 0x2e9   :  { %v2389_v38 = vpop.f32.mrb[20].mxu0  ;;  %2407 = vmatprep.mubr.bf16.mxu0 %v651_v36  ;;  %v2707_v36 = vld [vmem:[#allocation6 + $0xa8] sm:$0xff]  }
 0x2ea   :  { %v628_v39 = vpop.f32.mrb[21].mxu0  ;;  %2408 = vmatmul.mubr.bf16.vlgmr.msra.gmra.mrb[24].mxu0 %v652_v35  ;;  %v649_v41 = vmul.f32 %v2389_v38, %v2974_v14  ;;  %v2706_v35 = vld [vmem:[#allocation6 + $0xa0] sm:$0xff]   ;;  %v2709_v38 = vld [vmem:[#allocation6 + $0xb8] sm:$0xff]  }
 0x2eb   :  { %2416 = vmatpush3.bf16.msra.mxu0 %v2694_v26  ;;  %v2390_v40 = vpop.f32.mrb[22].mxu0  ;;  %v647_v45 = vmul.f32 %v628_v39, %v2966_v4  ;;  %v2710_v39 = vld [vmem:[#allocation4 + $0x80] sm:$0xff]  }
 0x2ec   :  { %v650_v42 = vmul.f32 %v2390_v40, %v2976_v16  ;;  %v631_v43 = vpop.f32.mrb[23].mxu0  ;;  %2417 = vmatprep.subr.bf16.mxu0 %v2695_v37 }
 0x2ed   :  { %v648_v46 = vmul.f32 %v631_v43, %v2970_v8 }
 0x2ee   :  { %v654_v47 = vpack.c.bf16 %v650_v42, %v649_v41 }
 0x2ef   :  { %v653_v48 = vpack.c.bf16 %v648_v46, %v647_v45  ;;  %2418 = vmatpush3.bf16.msra.mxu0 %v2695_v37  ;;  %v2708_v37 = vld [vmem:[#allocation6 + $0xb0] sm:$0xff]  }
 0x2f0   :  { %2419 = vmatprep.subr.bf16.mxu0 %v2696_v44 }
 0x2f1   :  { %2411 = vmatprep.mubr.bf16.mxu0 %v653_v48 }
 0x2f2   :  { %2412 = vmatmul.mubr.bf16.gmra.mrb[28].mxu0 %v654_v47 }
 0x2f3   :  { %2420 = vmatpush3.bf16.msra.mxu0 %v2696_v44  ;;  %2431 = vmatprep.mubr.bf16.mxu0 %v2989_v56 }
 0x2f4   :  { %2421 = vmatprep.subr.bf16.mxu0 %v2697_v49 }
 0x2f7   :  { %2422 = vmatpush3.bf16.msra.mxu0 %v2697_v49 }
 0x2f8   :  { %2423 = vmatprep.subr.bf16.mxu0 %v2698_v50 }
 0x2fb   :  { %2424 = vmatpush3.bf16.msra.mxu0 %v2698_v50  ;;  %v2711_v50 = vld [vmem:[#allocation4 + $0x88] sm:$0xff]  }
 0x2fc   :  { %2425 = vmatprep.subr.bf16.mxu0 %v2699_v51 }
 0x2ff   :  { %2426 = vmatpush3.bf16.msra.mxu0 %v2699_v51 }
 0x300   :  { %2427 = vmatprep.subr.bf16.mxu0 %v2700_v52 }
 0x303   :  { %2428 = vmatpush3.bf16.msra.mxu0 %v2700_v52 }
 0x304   :  { %2429 = vmatprep.subr.bf16.mxu0 %v2701_v54 }
 0x307   :  { %2430 = vmatpush3.bf16.msra.mxu0 %v2701_v54 }
 0x30a   :  { %2432 = vmatmul.mubr.bf16.vlgmr.msra.gmra.mrb[24].mxu0 %v2987_v53 }
 0x30b   :  { %2435 = vmatprep.mubr.bf16.mxu0 %v2997_v17 }
 0x312   :  { %2436 = vmatmul.mubr.bf16.gmra.mrb[28].mxu0 %v2995_v15 }
 0x313   :  { %2511 = vmatprep.mubr.msk.bf16.mxu0 %vm162_vm0, %v2867_v0 }
 0x3dd   :  { %v2433_v56 = vpop.f32.mrb[24].mxu0 }
 0x3de   :  { %v908_v61 = vadd.f32 %v2433_v56, %v2083_v55  ;;  %v867_v62 = vpop.f32.mrb[25].mxu0 }
 0x3df   :  { %v906_v63 = vadd.f32 %v2083_v55, %v867_v62  ;;  %v2434_v5 = vpop.f32.mrb[26].mxu0  ;;  %v2712_v62 = vld [vmem:[#allocation4 + $0x90] sm:$0xff]  }
 0x3e0   :  { %v909_v6 = vadd.f32 %v2434_v5, %v2083_v55  ;;  %v870_v7 = vpop.f32.mrb[27].mxu0  ;;  %v916_v53 = vmax.f32 %v908_v61, 0.0 }
 0x3e1   :  { %v907_v9 = vadd.f32 %v2083_v55, %v870_v7  ;;  %v914_v11 = vmax.f32 %v906_v63, 0.0 }
 0x3e2   :  { %v917_v10 = vmax.f32 %v909_v6, 0.0 }
 0x3e3   :  { %v915_v12 = vmax.f32 %v907_v9, 0.0  ;;  %v2713_v9 = vld [vmem:[#allocation4 + $0x98] sm:$0xff]  }
 0x3e4   :  { %v3026_v13 = vpack.c.bf16 %v917_v10, %v916_v53  ;;  %v2714_v53 = vld [vmem:[#allocation4 + $0xa0] sm:$0xff]   ;;  %v2715_v10 = vld [vmem:[#allocation4 + $0xa8] sm:$0xff]  }
 0x3e5   :  { %v3028_v15 = vpack.c.bf16 %v915_v12, %v914_v11  ;;  %v2437_v17 = vpop.f32.mrb[28].mxu0  ;;  %v2716_v11 = vld [vmem:[#allocation4 + $0xb0] sm:$0xff]   ;;  %v2717_v12 = vld [vmem:[#allocation4 + $0xb8] sm:$0xff]  }
 0x3e6   :  { %v912_v18 = vadd.f32 %v2437_v17, %v2083_v55  ;;  %v883_v19 = vpop.f32.mrb[29].mxu0 }
 0x3e7   :  { %v910_v20 = vadd.f32 %v2083_v55, %v883_v19  ;;  %v2438_v21 = vpop.f32.mrb[30].mxu0  ;;  %2439 = vmatprep.subr.bf16.mxu1 %v3028_v15 }
 0x3e8   :  { %v913_v22 = vadd.f32 %v2438_v21, %v2083_v55  ;;  %v886_v23 = vpop.f32.mrb[31].mxu0  ;;  %2440 = vmatpush3.bf16.msra.mxu1 %v3028_v15  ;;  %v920_v25 = vmax.f32 %v912_v18, 0.0 }
 0x3e9   :  { %v911_v24 = vadd.f32 %v2083_v55, %v886_v23  ;;  %2441 = vmatprep.subr.bf16.mxu1 %v3026_v13  ;;  %v918_v27 = vmax.f32 %v910_v20, 0.0 }
 0x3ea   :  { %v921_v26 = vmax.f32 %v913_v22, 0.0 }
 0x3eb   :  { %v919_v28 = vmax.f32 %v911_v24, 0.0 }
 0x3ec   :  { %v3033_v29 = vpack.c.bf16 %v921_v26, %v920_v25  ;;  %2442 = vmatpush3.bf16.msra.mxu1 %v3026_v13 }
 0x3ed   :  { %v3036_v30 = vpack.c.bf16 %v919_v28, %v918_v27 }
 0x3ef   :  { %2443 = vmatprep.subr.bf16.mxu1 %v3036_v30 }
 0x3f0   :  { %2444 = vmatpush3.bf16.msra.mxu1 %v3036_v30 }
 0x3f1   :  { %2445 = vmatprep.subr.bf16.mxu1 %v3033_v29 }
 0x3f4   :  { %2446 = vmatpush3.bf16.msra.mxu1 %v3033_v29 }
 0x3f5   :  { %2455 = vmatprep.subr.bf16.mxu1 %v2702_v31 }
 0x3f7   :  { %2448 = vmatmul.mubr.msk.bf16.vlgmr.msra.gmra.mrb[8].mxu1 %vm162_vm0, %v2872_v1 }
 0x3f8   :  { %2451 = vmatprep.mubr.msk.bf16.mxu1 %vm162_vm0, %v2877_v2  ;;  %2456 = vmatpush3.bf16.msra.mxu1 %v2702_v31 }
 0x3f9   :  { %2457 = vmatprep.subr.bf16.mxu1 %v2703_v32 }
 0x3fc   :  { %2458 = vmatpush3.bf16.msra.mxu1 %v2703_v32 }
 0x3fd   :  { %2459 = vmatprep.subr.bf16.mxu1 %v2704_v33 }
 0x3ff   :  { %2452 = vmatmul.mubr.msk.bf16.gmra.mrb[12].mxu1 %vm162_vm0, %v2882_v3 }
 0x400   :  { %2460 = vmatpush3.bf16.msra.mxu1 %v2704_v33 }
 0x401   :  { %2461 = vmatprep.subr.bf16.mxu1 %v2705_v34 }
 0x404   :  { %2462 = vmatpush3.bf16.msra.mxu1 %v2705_v34 }
 0x405   :  { %2463 = vmatprep.subr.bf16.mxu1 %v2706_v35 }
 0x408   :  { %2464 = vmatpush3.bf16.msra.mxu1 %v2706_v35 }
 0x409   :  { %2465 = vmatprep.subr.bf16.mxu1 %v2707_v36 }
 0x40c   :  { %2466 = vmatpush3.bf16.msra.mxu1 %v2707_v36 }
 0x40d   :  { %2467 = vmatprep.subr.bf16.mxu1 %v2708_v37 }
 0x410   :  { %2468 = vmatpush3.bf16.msra.mxu1 %v2708_v37 }
 0x411   :  { %2469 = vmatprep.subr.bf16.mxu1 %v2709_v38 }
 0x414   :  { %2470 = vmatpush3.bf16.msra.mxu1 %v2709_v38 }
 0x415   :  { %2479 = vmatprep.subr.bf16.mxu1 %v2710_v39 }
 0x4ca   :  { %v2449_v40 = vpop.f32.mrb[8].mxu1 }
 0x4cb   :  { %v977_v41 = vpop.f32.mrb[9].mxu1  ;;  %v1010_v43 = vmul.f32 %v2449_v40, %v2960_v58 }
 0x4cc   :  { %v2450_v42 = vpop.f32.mrb[10].mxu1  ;;  %v1008_v46 = vmul.f32 %v977_v41, %v2958_v57 }
 0x4cd   :  { %v1011_v44 = vmul.f32 %v2450_v42, %v2964_v60  ;;  %v980_v45 = vpop.f32.mrb[11].mxu1 }
 0x4ce   :  { %v1009_v47 = vmul.f32 %v980_v45, %v2962_v59  ;;  %v2720_v45 = vld [vmem:[#allocation6 + $0xd0] sm:$0xff]  }
 0x4cf   :  { %v1017_v48 = vpack.c.bf16 %v1011_v44, %v1010_v43  ;;  %v2718_v43 = vld [vmem:[#allocation6 + $0xc0] sm:$0xff]   ;;  %v2719_v44 = vld [vmem:[#allocation6 + $0xc8] sm:$0xff]  }
 0x4d0   :  { %v1016_v49 = vpack.c.bf16 %v1009_v47, %v1008_v46  ;;  %v2721_v46 = vld [vmem:[#allocation6 + $0xd8] sm:$0xff]   ;;  %v2722_v47 = vld [vmem:[#allocation6 + $0xe0] sm:$0xff]  }
 0x4d2   :  { %v2453_v51 = vpop.f32.mrb[12].mxu1  ;;  %2471 = vmatprep.mubr.bf16.mxu1 %v1016_v49  ;;  %v2724_v49 = vld [vmem:[#allocation6 + $0xf0] sm:$0xff]  }
 0x4d3   :  { %v993_v52 = vpop.f32.mrb[13].mxu1  ;;  %2472 = vmatmul.mubr.bf16.vlgmr.msra.gmra.mrb[16].mxu1 %v1017_v48  ;;  %v1014_v55 = vmul.f32 %v2453_v51, %v2974_v14  ;;  %v2723_v48 = vld [vmem:[#allocation6 + $0xe8] sm:$0xff]   ;;  %v2726_v51 = vld [vmem:[#allocation4 + $0xc0] sm:$0xff]  }
 0x4d4   :  { %2480 = vmatpush3.bf16.msra.mxu1 %v2710_v39  ;;  %v2454_v54 = vpop.f32.mrb[14].mxu1  ;;  %v1012_v63 = vmul.f32 %v993_v52, %v2966_v4 }
 0x4d5   :  { %v1015_v56 = vmul.f32 %v2454_v54, %v2976_v16  ;;  %v996_v61 = vpop.f32.mrb[15].mxu1  ;;  %2481 = vmatprep.subr.bf16.mxu1 %v2711_v50 }
 0x4d6   :  { %v1013_v5 = vmul.f32 %v996_v61, %v2970_v8 }
 0x4d7   :  { %v1019_v6 = vpack.c.bf16 %v1015_v56, %v1014_v55 }
 0x4d8   :  { %v1018_v7 = vpack.c.bf16 %v1013_v5, %v1012_v63  ;;  %2482 = vmatpush3.bf16.msra.mxu1 %v2711_v50  ;;  %v2725_v50 = vld [vmem:[#allocation6 + $0xf8] sm:$0xff]  }
 0x4d9   :  { %2483 = vmatprep.subr.bf16.mxu1 %v2712_v62 }
 0x4da   :  { %2475 = vmatprep.mubr.bf16.mxu1 %v1018_v7 }
 0x4db   :  { %2476 = vmatmul.mubr.bf16.gmra.mrb[20].mxu1 %v1019_v6 }
 0x4dc   :  { %2484 = vmatpush3.bf16.msra.mxu1 %v2712_v62  ;;  %2495 = vmatprep.mubr.bf16.mxu1 %v3028_v15  ;;  %v2105_v15 = vld [vmem:[%s3167_s4 + $0x2] ss:$0 sm:$0xff] }
 0x4dd   :  { %2485 = vmatprep.subr.bf16.mxu1 %v2713_v9 }
 0x4e0   :  { %2486 = vmatpush3.bf16.msra.mxu1 %v2713_v9  ;;  %v2727_v9 = vld [vmem:[#allocation4 + $0xc8] sm:$0xff]  }
 0x4e1   :  { %2487 = vmatprep.subr.bf16.mxu1 %v2714_v53 }
 0x4e4   :  { %2488 = vmatpush3.bf16.msra.mxu1 %v2714_v53 }
 0x4e5   :  { %2489 = vmatprep.subr.bf16.mxu1 %v2715_v10 }
 0x4e8   :  { %2490 = vmatpush3.bf16.msra.mxu1 %v2715_v10 }
 0x4e9   :  { %2491 = vmatprep.subr.bf16.mxu1 %v2716_v11 }
 0x4ec   :  { %2492 = vmatpush3.bf16.msra.mxu1 %v2716_v11 }
 0x4ed   :  { %2493 = vmatprep.subr.bf16.mxu1 %v2717_v12 }
 0x4f0   :  { %2494 = vmatpush3.bf16.msra.mxu1 %v2717_v12 }
 0x4f3   :  { %2496 = vmatmul.mubr.bf16.vlgmr.msra.gmra.mrb[16].mxu1 %v3026_v13 }
 0x4f4   :  { %2499 = vmatprep.mubr.bf16.mxu1 %v3036_v30 }
 0x4fb   :  { %2500 = vmatmul.mubr.bf16.gmra.mrb[20].mxu1 %v3033_v29 }
 0x4fc   :  { %2575 = vmatprep.mubr.msk.bf16.mxu1 %vm162_vm0, %v2867_v0 }
 0x5c6   :  { %v2497_v17 = vpop.f32.mrb[16].mxu1 }
 0x5c7   :  { %v1273_v18 = vadd.f32 %v2497_v17, %v2105_v15  ;;  %v1232_v19 = vpop.f32.mrb[17].mxu1 }
 0x5c8   :  { %v1271_v20 = vadd.f32 %v2105_v15, %v1232_v19  ;;  %v2498_v21 = vpop.f32.mrb[18].mxu1 }
 0x5c9   :  { %v1274_v22 = vadd.f32 %v2498_v21, %v2105_v15  ;;  %v1235_v23 = vpop.f32.mrb[19].mxu1  ;;  %v1281_v13 = vmax.f32 %v1273_v18, 0.0  ;;  %v2728_v18 = vld [vmem:[#allocation4 + $0xd0] sm:$0xff]  }
 0x5ca   :  { %v1272_v24 = vadd.f32 %v2105_v15, %v1235_v23  ;;  %v1279_v26 = vmax.f32 %v1271_v20, 0.0  ;;  %v2729_v23 = vld [vmem:[#allocation4 + $0xd8] sm:$0xff]  }
 0x5cb   :  { %v1282_v25 = vmax.f32 %v1274_v22, 0.0 }
 0x5cc   :  { %v1280_v27 = vmax.f32 %v1272_v24, 0.0  ;;  %v2730_v24 = vld [vmem:[#allocation4 + $0xe0] sm:$0xff]  }
 0x5cd   :  { %v3065_v28 = vpack.c.bf16 %v1282_v25, %v1281_v13  ;;  %v2731_v13 = vld [vmem:[#allocation4 + $0xe8] sm:$0xff]   ;;  %v2732_v25 = vld [vmem:[#allocation4 + $0xf0] sm:$0xff]  }
 0x5ce   :  { %v3067_v29 = vpack.c.bf16 %v1280_v27, %v1279_v26  ;;  %v2501_v0 = vpop.f32.mrb[20].mxu1  ;;  %v2733_v26 = vld [vmem:[#allocation4 + $0xf8] sm:$0xff]   ;;  %v2127_v27 = vld [vmem:[%s3167_s4 + $0x3] ss:$0 sm:$0xff] }
 0x5cf   :  { %v1277_v30 = vadd.f32 %v2501_v0, %v2105_v15  ;;  %v1248_v31 = vpop.f32.mrb[21].mxu1 }
 0x5d0   :  { %v1275_v32 = vadd.f32 %v2105_v15, %v1248_v31  ;;  %v2502_v33 = vpop.f32.mrb[22].mxu1  ;;  %2503 = vmatprep.subr.bf16.mxu0 %v3067_v29 }
 0x5d1   :  { %v1278_v34 = vadd.f32 %v2502_v33, %v2105_v15  ;;  %v1251_v35 = vpop.f32.mrb[23].mxu1  ;;  %2504 = vmatpush3.bf16.msra.mxu0 %v3067_v29  ;;  %v1285_v37 = vmax.f32 %v1277_v30, 0.0 }
 0x5d2   :  { %v1276_v36 = vadd.f32 %v2105_v15, %v1251_v35  ;;  %2505 = vmatprep.subr.bf16.mxu0 %v3065_v28  ;;  %v1283_v39 = vmax.f32 %v1275_v32, 0.0 }
 0x5d3   :  { %v1286_v38 = vmax.f32 %v1278_v34, 0.0 }
 0x5d4   :  { %v1284_v40 = vmax.f32 %v1276_v36, 0.0 }
 0x5d5   :  { %v3072_v41 = vpack.c.bf16 %v1286_v38, %v1285_v37  ;;  %2506 = vmatpush3.bf16.msra.mxu0 %v3065_v28 }
 0x5d6   :  { %v3075_v42 = vpack.c.bf16 %v1284_v40, %v1283_v39 }
 0x5d8   :  { %2507 = vmatprep.subr.bf16.mxu0 %v3075_v42 }
 0x5d9   :  { %2508 = vmatpush3.bf16.msra.mxu0 %v3075_v42 }
 0x5da   :  { %2509 = vmatprep.subr.bf16.mxu0 %v3072_v41 }
 0x5dd   :  { %2510 = vmatpush3.bf16.msra.mxu0 %v3072_v41 }
 0x5de   :  { %2519 = vmatprep.subr.bf16.mxu0 %v2718_v43 }
 0x5e0   :  { %2512 = vmatmul.mubr.msk.bf16.vlgmr.msra.gmra.mrb[32].mxu0 %vm162_vm0, %v2872_v1 }
 0x5e1   :  { %2515 = vmatprep.mubr.msk.bf16.mxu0 %vm162_vm0, %v2877_v2  ;;  %2520 = vmatpush3.bf16.msra.mxu0 %v2718_v43 }
 0x5e2   :  { %2521 = vmatprep.subr.bf16.mxu0 %v2719_v44 }
 0x5e5   :  { %2522 = vmatpush3.bf16.msra.mxu0 %v2719_v44 }
 0x5e6   :  { %2523 = vmatprep.subr.bf16.mxu0 %v2720_v45 }
 0x5e8   :  { %2516 = vmatmul.mubr.msk.bf16.gmra.mrb[36].mxu0 %vm162_vm0, %v2882_v3 }
 0x5e9   :  { %2524 = vmatpush3.bf16.msra.mxu0 %v2720_v45 }
 0x5ea   :  { %2525 = vmatprep.subr.bf16.mxu0 %v2721_v46 }
 0x5ed   :  { %2526 = vmatpush3.bf16.msra.mxu0 %v2721_v46 }
 0x5ee   :  { %2527 = vmatprep.subr.bf16.mxu0 %v2722_v47 }
 0x5f1   :  { %2528 = vmatpush3.bf16.msra.mxu0 %v2722_v47 }
 0x5f2   :  { %2529 = vmatprep.subr.bf16.mxu0 %v2723_v48 }
 0x5f5   :  { %2530 = vmatpush3.bf16.msra.mxu0 %v2723_v48 }
 0x5f6   :  { %2531 = vmatprep.subr.bf16.mxu0 %v2724_v49 }
 0x5f9   :  { %2532 = vmatpush3.bf16.msra.mxu0 %v2724_v49 }
 0x5fa   :  { %2533 = vmatprep.subr.bf16.mxu0 %v2725_v50 }
 0x5fd   :  { %2534 = vmatpush3.bf16.msra.mxu0 %v2725_v50 }
 0x5fe   :  { %2543 = vmatprep.subr.bf16.mxu0 %v2726_v51 }
 0x6b3   :  { %v2513_v52 = vpop.f32.mrb[32].mxu0 }
 0x6b4   :  { %v1342_v54 = vpop.f32.mrb[33].mxu0  ;;  %v1375_v56 = vmul.f32 %v2513_v52, %v2960_v58 }
 0x6b5   :  { %v2514_v55 = vpop.f32.mrb[34].mxu0  ;;  %v1373_v63 = vmul.f32 %v1342_v54, %v2958_v57 }
 0x6b6   :  { %v1376_v61 = vmul.f32 %v2514_v55, %v2964_v60  ;;  %v1345_v62 = vpop.f32.mrb[35].mxu0 }
 0x6b7   :  { %v1374_v5 = vmul.f32 %v1345_v62, %v2962_v59  ;;  %v2736_v62 = vld [vmem:[#allocation6 + $0x110] sm:$0xff]  }
 0x6b8   :  { %v1382_v6 = vpack.c.bf16 %v1376_v61, %v1375_v56  ;;  %v2734_v56 = vld [vmem:[#allocation6 + $0x100] sm:$0xff]   ;;  %v2735_v61 = vld [vmem:[#allocation6 + $0x108] sm:$0xff]  }
 0x6b9   :  { %v1381_v7 = vpack.c.bf16 %v1374_v5, %v1373_v63  ;;  %v2737_v63 = vld [vmem:[#allocation6 + $0x118] sm:$0xff]   ;;  %v2738_v5 = vld [vmem:[#allocation6 + $0x120] sm:$0xff]  }
 0x6bb   :  { %v2517_v53 = vpop.f32.mrb[36].mxu0  ;;  %2535 = vmatprep.mubr.bf16.mxu0 %v1381_v7  ;;  %v2742_v7 = vld [vmem:[#allocation4 + $0x100] sm:$0xff]  }
 0x6bc   :  { %v1358_v10 = vpop.f32.mrb[37].mxu0  ;;  %2536 = vmatmul.mubr.bf16.vlgmr.msra.gmra.mrb[40].mxu0 %v1382_v6  ;;  %v1379_v12 = vmul.f32 %v2517_v53, %v2974_v14  ;;  %v2739_v6 = vld [vmem:[#allocation6 + $0x128] sm:$0xff]  }
 0x6bd   :  { %2544 = vmatpush3.bf16.msra.mxu0 %v2726_v51  ;;  %v2518_v11 = vpop.f32.mrb[38].mxu0  ;;  %v1377_v19 = vmul.f32 %v1358_v10, %v2966_v4 }
 0x6be   :  { %v1380_v15 = vmul.f32 %v2518_v11, %v2976_v16  ;;  %v1361_v17 = vpop.f32.mrb[39].mxu0  ;;  %2545 = vmatprep.subr.bf16.mxu0 %v2727_v9 }
 0x6bf   :  { %v1378_v20 = vmul.f32 %v1361_v17, %v2970_v8 }
 0x6c0   :  { %v1384_v21 = vpack.c.bf16 %v1380_v15, %v1379_v12 }
 0x6c1   :  { %v1383_v22 = vpack.c.bf16 %v1378_v20, %v1377_v19  ;;  %2546 = vmatpush3.bf16.msra.mxu0 %v2727_v9  ;;  %v2743_v20 = vld [vmem:[#allocation4 + $0x108] sm:$0xff]  }
 0x6c2   :  { %2547 = vmatprep.subr.bf16.mxu0 %v2728_v18 }
 0x6c3   :  { %2539 = vmatprep.mubr.bf16.mxu0 %v1383_v22 }
 0x6c4   :  { %2540 = vmatmul.mubr.bf16.gmra.mrb[44].mxu0 %v1384_v21 }
 0x6c5   :  { %2548 = vmatpush3.bf16.msra.mxu0 %v2728_v18  ;;  %2559 = vmatprep.mubr.bf16.mxu0 %v3067_v29 }
 0x6c6   :  { %2549 = vmatprep.subr.bf16.mxu0 %v2729_v23 }
 0x6c9   :  { %2550 = vmatpush3.bf16.msra.mxu0 %v2729_v23 }
 0x6ca   :  { %2551 = vmatprep.subr.bf16.mxu0 %v2730_v24 }
 0x6cd   :  { %2552 = vmatpush3.bf16.msra.mxu0 %v2730_v24 }
 0x6ce   :  { %2553 = vmatprep.subr.bf16.mxu0 %v2731_v13 }
 0x6d1   :  { %2554 = vmatpush3.bf16.msra.mxu0 %v2731_v13 }
 0x6d2   :  { %2555 = vmatprep.subr.bf16.mxu0 %v2732_v25 }
 0x6d5   :  { %2556 = vmatpush3.bf16.msra.mxu0 %v2732_v25 }
 0x6d6   :  { %2557 = vmatprep.subr.bf16.mxu0 %v2733_v26 }
 0x6d9   :  { %2558 = vmatpush3.bf16.msra.mxu0 %v2733_v26 }
 0x6dc   :  { %2560 = vmatmul.mubr.bf16.vlgmr.msra.gmra.mrb[40].mxu0 %v3065_v28 }
 0x6dd   :  { %2563 = vmatprep.mubr.bf16.mxu0 %v3075_v42 }
 0x6e4   :  { %2564 = vmatmul.mubr.bf16.gmra.mrb[44].mxu0 %v3072_v41 }
 0x7af   :  { %v2561_v29 = vpop.f32.mrb[40].mxu0 }
 0x7b0   :  { %v1638_v0 = vadd.f32 %v2561_v29, %v2127_v27  ;;  %v1597_v30 = vpop.f32.mrb[41].mxu0  ;;  %v2149_v29 = vld [vmem:[%s3167_s4 + $0x4] ss:$0 sm:$0xff] }
 0x7b1   :  { %v1636_v31 = vadd.f32 %v2127_v27, %v1597_v30  ;;  %v2562_v32 = vpop.f32.mrb[42].mxu0 }
 0x7b2   :  { %v1639_v33 = vadd.f32 %v2562_v32, %v2127_v27  ;;  %v1600_v34 = vpop.f32.mrb[43].mxu0  ;;  %v1646_v36 = vmax.f32 %v1638_v0, 0.0 }
 0x7b3   :  { %v1637_v35 = vadd.f32 %v2127_v27, %v1600_v34  ;;  %v1644_v38 = vmax.f32 %v1636_v31, 0.0 }
 0x7b4   :  { %v1647_v37 = vmax.f32 %v1639_v33, 0.0 }
 0x7b5   :  { %v1645_v28 = vmax.f32 %v1637_v35, 0.0 }
 0x7b6   :  { %v3102_v39 = vpack.c.bf16 %v1647_v37, %v1646_v36 }
 0x7b7   :  { %v3104_v40 = vpack.c.bf16 %v1645_v28, %v1644_v38  ;;  %v2565_v41 = vpop.f32.mrb[44].mxu0 }
 0x7b8   :  { %v1642_v42 = vadd.f32 %v2565_v41, %v2127_v27  ;;  %v1613_v43 = vpop.f32.mrb[45].mxu0 }
 0x7b9   :  { %v1640_v44 = vadd.f32 %v2127_v27, %v1613_v43  ;;  %v2566_v45 = vpop.f32.mrb[46].mxu0  ;;  %2567 = vmatprep.subr.bf16.mxu1 %v3104_v40 }
 0x7ba   :  { %v1643_v46 = vadd.f32 %v2566_v45, %v2127_v27  ;;  %v1616_v47 = vpop.f32.mrb[47].mxu0  ;;  %2568 = vmatpush3.bf16.msra.mxu1 %v3104_v40  ;;  %v1650_v49 = vmax.f32 %v1642_v42, 0.0 }
 0x7bb   :  { %v1641_v48 = vadd.f32 %v2127_v27, %v1616_v47  ;;  %2569 = vmatprep.subr.bf16.mxu1 %v3102_v39  ;;  %v1648_v51 = vmax.f32 %v1640_v44, 0.0  ;;  %v2745_v27 = vld [vmem:[#allocation4 + $0x118] sm:$0xff]  }
 0x7bc   :  { %v1651_v50 = vmax.f32 %v1643_v46, 0.0 }
 0x7bd   :  { %v1649_v52 = vmax.f32 %v1641_v48, 0.0 }
 0x7be   :  { %v3109_v54 = vpack.c.bf16 %v1651_v50, %v1650_v49  ;;  %2570 = vmatpush3.bf16.msra.mxu1 %v3102_v39 }
 0x7bf   :  { %v3112_v55 = vpack.c.bf16 %v1649_v52, %v1648_v51 }
 0x7c1   :  { %2571 = vmatprep.subr.bf16.mxu1 %v3112_v55 }
 0x7c2   :  { %2572 = vmatpush3.bf16.msra.mxu1 %v3112_v55 }
 0x7c3   :  { %2573 = vmatprep.subr.bf16.mxu1 %v3109_v54 }
 0x7c6   :  { %2574 = vmatpush3.bf16.msra.mxu1 %v3109_v54 }
 0x7c7   :  { %2583 = vmatprep.subr.bf16.mxu1 %v2734_v56 }
 0x7c9   :  { %2576 = vmatmul.mubr.msk.bf16.vlgmr.msra.gmra.mrb[24].mxu1 %vm162_vm0, %v2872_v1  ;;  %v2740_v1 = vld [vmem:[#allocation6 + $0x130] sm:$0xff]  }
 0x7ca   :  { %2579 = vmatprep.mubr.msk.bf16.mxu1 %vm162_vm0, %v2877_v2  ;;  %2584 = vmatpush3.bf16.msra.mxu1 %v2734_v56  ;;  %v2741_v2 = vld [vmem:[#allocation6 + $0x138] sm:$0xff]  }
 0x7cb   :  { %2585 = vmatprep.subr.bf16.mxu1 %v2735_v61 }
 0x7ce   :  { %2586 = vmatpush3.bf16.msra.mxu1 %v2735_v61 }
 0x7cf   :  { %2587 = vmatprep.subr.bf16.mxu1 %v2736_v62 }
 0x7d1   :  { %2580 = vmatmul.mubr.msk.bf16.gmra.mrb[28].mxu1 %vm162_vm0, %v2882_v3 }
 0x7d2   :  { %2588 = vmatpush3.bf16.msra.mxu1 %v2736_v62 }
 0x7d3   :  { %2589 = vmatprep.subr.bf16.mxu1 %v2737_v63 }
 0x7d6   :  { %2590 = vmatpush3.bf16.msra.mxu1 %v2737_v63 }
 0x7d7   :  { %2591 = vmatprep.subr.bf16.mxu1 %v2738_v5 }
 0x7da   :  { %2592 = vmatpush3.bf16.msra.mxu1 %v2738_v5 }
 0x7db   :  { %2593 = vmatprep.subr.bf16.mxu1 %v2739_v6 }
 0x7de   :  { %2594 = vmatpush3.bf16.msra.mxu1 %v2739_v6 }
 0x7df   :  { %2595 = vmatprep.subr.bf16.mxu1 %v2740_v1 }
 0x7e2   :  { %2596 = vmatpush3.bf16.msra.mxu1 %v2740_v1 }
 0x7e3   :  { %2597 = vmatprep.subr.bf16.mxu1 %v2741_v2 }
 0x7e6   :  { %2598 = vmatpush3.bf16.msra.mxu1 %v2741_v2 }
 0x7e7   :  { %2607 = vmatprep.subr.bf16.mxu1 %v2742_v7 }
 0x89c   :  { %v2577_v9 = vpop.f32.mrb[24].mxu1 }
 0x89d   :  { %v1707_v53 = vpop.f32.mrb[25].mxu1  ;;  %v1740_v10 = vmul.f32 %v2577_v9, %v2960_v58 }
 0x89e   :  { %v2578_v3 = vpop.f32.mrb[26].mxu1  ;;  %v1738_v15 = vmul.f32 %v1707_v53, %v2958_v57 }
 0x89f   :  { %v1741_v11 = vmul.f32 %v2578_v3, %v2964_v60  ;;  %v1710_v12 = vpop.f32.mrb[27].mxu1  ;;  %v2744_v60 = vld [vmem:[#allocation4 + $0x110] sm:$0xff]  }
 0x8a0   :  { %v1739_v17 = vmul.f32 %v1710_v12, %v2962_v59 }
 0x8a1   :  { %v1747_v18 = vpack.c.bf16 %v1741_v11, %v1740_v10 }
 0x8a2   :  { %v1746_v19 = vpack.c.bf16 %v1739_v17, %v1738_v15 }
 0x8a4   :  { %v2581_v21 = vpop.f32.mrb[28].mxu1  ;;  %2599 = vmatprep.mubr.bf16.mxu1 %v1746_v19 }
 0x8a5   :  { %v1723_v22 = vpop.f32.mrb[29].mxu1  ;;  %2600 = vmatmul.mubr.bf16.vlgmr.msra.gmra.mrb[32].mxu1 %v1747_v18  ;;  %v1744_v24 = vmul.f32 %v2581_v21, %v2974_v14  ;;  %v2746_v14 = vld [vmem:[#allocation4 + $0x120] sm:$0xff]  }
 0x8a6   :  { %2608 = vmatpush3.bf16.msra.mxu1 %v2742_v7  ;;  %v2582_v23 = vpop.f32.mrb[30].mxu1  ;;  %v1742_v57 = vmul.f32 %v1723_v22, %v2966_v4  ;;  %v2748_v4 = vld [vmem:[#allocation4 + $0x130] sm:$0xff]  }
 0x8a7   :  { %v1745_v58 = vmul.f32 %v2582_v23, %v2976_v16  ;;  %v1726_v13 = vpop.f32.mrb[31].mxu1  ;;  %2609 = vmatprep.subr.bf16.mxu1 %v2743_v20  ;;  %v2747_v16 = vld [vmem:[#allocation4 + $0x128] sm:$0xff]  }
 0x8a8   :  { %v1743_v59 = vmul.f32 %v1726_v13, %v2970_v8  ;;  %v2749_v8 = vld [vmem:[#allocation4 + $0x138] sm:$0xff]  }
 0x8a9   :  { %v1749_v25 = vpack.c.bf16 %v1745_v58, %v1744_v24 }
 0x8aa   :  { %v1748_v26 = vpack.c.bf16 %v1743_v59, %v1742_v57  ;;  %2610 = vmatpush3.bf16.msra.mxu1 %v2743_v20 }
 0x8ab   :  { %2611 = vmatprep.subr.bf16.mxu1 %v2744_v60 }
 0x8ac   :  { %2603 = vmatprep.mubr.bf16.mxu1 %v1748_v26 }
 0x8ad   :  { %2604 = vmatmul.mubr.bf16.gmra.mrb[36].mxu1 %v1749_v25 }
 0x8ae   :  { %2612 = vmatpush3.bf16.msra.mxu1 %v2744_v60  ;;  %2623 = vmatprep.mubr.bf16.mxu1 %v3104_v40 }
 0x8af   :  { %2613 = vmatprep.subr.bf16.mxu1 %v2745_v27 }
 0x8b2   :  { %2614 = vmatpush3.bf16.msra.mxu1 %v2745_v27 }
 0x8b3   :  { %2615 = vmatprep.subr.bf16.mxu1 %v2746_v14 }
 0x8b6   :  { %2616 = vmatpush3.bf16.msra.mxu1 %v2746_v14 }
 0x8b7   :  { %2617 = vmatprep.subr.bf16.mxu1 %v2747_v16 }
 0x8ba   :  { %2618 = vmatpush3.bf16.msra.mxu1 %v2747_v16 }
 0x8bb   :  { %2619 = vmatprep.subr.bf16.mxu1 %v2748_v4 }
 0x8be   :  { %2620 = vmatpush3.bf16.msra.mxu1 %v2748_v4 }
 0x8bf   :  { %2621 = vmatprep.subr.bf16.mxu1 %v2749_v8 }
 0x8c2   :  { %2622 = vmatpush3.bf16.msra.mxu1 %v2749_v8 }
 0x8c5   :  { %2624 = vmatmul.mubr.bf16.vlgmr.msra.gmra.mrb[32].mxu1 %v3102_v39 }
 0x8c6   :  { %2627 = vmatprep.mubr.bf16.mxu1 %v3112_v55 }
 0x8cd   :  { %2628 = vmatmul.mubr.bf16.gmra.mrb[36].mxu1 %v3109_v54 }
 0x998   :  { %v2625_v0 = vpop.f32.mrb[32].mxu1 }
 0x999   :  { %v2003_v30 = vadd.f32 %v2625_v0, %v2149_v29  ;;  %v1962_v31 = vpop.f32.mrb[33].mxu1 }
 0x99a   :  { %v2001_v32 = vadd.f32 %v2149_v29, %v1962_v31  ;;  %v2626_v33 = vpop.f32.mrb[34].mxu1 }
 0x99b   :  { %2011 = vst [vmem:[%s3169_s6 + $0x10] sm:$0xff] %v2003_v30  ;;  %v2004_v34 = vadd.f32 %v2626_v33, %v2149_v29  ;;  %v1965_v35 = vpop.f32.mrb[35].mxu1 }
 0x99c   :  { %2009 = vst [vmem:[%s3169_s6] sm:$0xff] %v2001_v32  ;;  %v2002_v36 = vadd.f32 %v2149_v29, %v1965_v35 }
 0x99d   :  { %2012 = vst [vmem:[%s3169_s6 + $0x18] sm:$0xff] %v2004_v34 }
 0x99e   :  { %2010 = vst [vmem:[%s3169_s6 + $0x8] sm:$0xff] %v2002_v36 }
 0x9a0   :  { %v2629_v37 = vpop.f32.mrb[36].mxu1 }
 0x9a1   :  { %v2007_v38 = vadd.f32 %v2629_v37, %v2149_v29  ;;  %v1978_v28 = vpop.f32.mrb[37].mxu1 }
 0x9a2   :  { %v2005_v39 = vadd.f32 %v2149_v29, %v1978_v28  ;;  %v2630_v40 = vpop.f32.mrb[38].mxu1 }
 0x9a3   :  { %2015 = vst [vmem:[%s3169_s6 + $0x30] sm:$0xff] %v2007_v38  ;;  %v2008_v41 = vadd.f32 %v2630_v40, %v2149_v29  ;;  %v1981_v42 = vpop.f32.mrb[39].mxu1 }
 0x9a4   :  { %2013 = vst [vmem:[%s3169_s6 + $0x20] sm:$0xff] %v2005_v39  ;;  %v2006_v43 = vadd.f32 %v2149_v29, %v1981_v42 }
 0x9a5   :  { %2016 = vst [vmem:[%s3169_s6 + $0x38] sm:$0xff] %v2008_v41 }
 0x9a6   :  { %2014 = vst [vmem:[%s3169_s6 + $0x28] sm:$0xff] %v2006_v43 }
 0x9a7   :  { %2021 = vsyncpa [#allocation5], 1 }
 0x9a8   :  { %2022 = vsyncpa [#allocation7], 1 }
 0x9a9   :  { %2023 = vsyncmov [#allocation3] }
 0x9ac   :  { %s2024_s29 = vpop.sfrf %2023 }
 0x9ad   :  { %p2150_p2 = scmp.ne.s32.totalorder %s2024_s29, 0 }
 0x9af   :  { %2028 = shalt.err (%p2150_p2)  }

</bundles_post_ra>
